<compile_context>
chip_gen: v7x
topology: tpu7x:2x2x1
jax: 0.10.0
libtpu: 0.0.40
codegen_flags: <defaults>
</compile_context>

<pallas_src>
import jax
import jax.numpy as jnp
from jax.experimental import pallas as pl
from jax.experimental.pallas import tpu as pltpu


def _gated_residual_kernel(x_ref, res_ref, w_ref, o_ref):
    # x_ref, res_ref, o_ref: (TM, D) row tiles of the flattened (B*S, D) inputs
    # w_ref: (2, D) folded gate weights; row 0 = w1 + w3, row 1 = w2 - w3
    x = x_ref[...].astype(jnp.float32)
    r = res_ref[...].astype(jnp.float32)
    wa = w_ref[0:1, :].astype(jnp.float32)     # (1, D), broadcasts over rows
    wb = w_ref[1:2, :].astype(jnp.float32)     # (1, D)

    # gate logit = cat(x, res, x-res) @ W.T  ==  sum(x*(w1+w3) + res*(w2-w3), -1)
    prod = x * wa + r * wb                       # VPU, (TM, D)
    logit = jnp.sum(prod, axis=-1, keepdims=True)  # XLU lane reduction, (TM, 1)
    gate = jax.nn.sigmoid(logit)                   # EUP

    # x*g + r*(1-g) == r + (x - r)*g
    o_ref[...] = (r + (x - r) * gate).astype(o_ref.dtype)


def gated_residual(x, res, w, *, tile_rows=1024):
    """GatedResidual forward.

    x, res : (B, S, D) arrays.
    w      : gate projection weight in torch ``nn.Linear(3*D, 1, bias=False).weight``
             layout, i.e. shape (1, 3*D) (a flat (3*D,) is also accepted).
    Returns x * gate + res * (1 - gate) with gate = sigmoid(cat(x, res, x-res) @ w.T).

    Performance notes: D should ideally be a multiple of 128 (lane-dense stores);
    the row tile is auto-capped so double-buffered x/res/out tiles stay within a
    conservative VMEM budget that also fits v7x (64 MiB physical / 32 MiB scoped).
    """
    B, S, D = x.shape
    R = B * S

    # Fold the three weight slices into a single (2, D) slab (done once, tiny).
    wf = w.reshape(3 * D).astype(jnp.float32)
    w1, w2, w3 = wf[0:D], wf[D:2 * D], wf[2 * D:3 * D]
    wc = jnp.stack([w1 + w3, w2 - w3], axis=0)   # (2, D)

    x2 = x.reshape(R, D)
    r2 = res.reshape(R, D)

    # Row-tile selection: as large as possible, but
    #  (a) keep 2x(x) + 2x(res) + 2x(out) double-buffered tiles under ~24 MiB,
    #  (b) never larger than R rounded up to the sublane multiple (8).
    itemsize = jnp.dtype(x.dtype).itemsize
    vmem_budget = 24 * 1024 * 1024
    tm_cap = max(8, (vmem_budget // (6 * D * itemsize)) // 8 * 8)
    tm = int(min(tile_rows, tm_cap, ((R + 7) // 8) * 8))

    grid = (pl.cdiv(R, tm),)  # ragged last tile handled by Pallas masking

    out = pl.pallas_call(
        _gated_residual_kernel,
        out_shape=jax.ShapeDtypeStruct((R, D), x.dtype),
        grid_spec=pltpu.PrefetchScalarGridSpec(
            num_scalar_prefetch=0,
            grid=grid,
            in_specs=[
                pl.BlockSpec((tm, D), lambda i: (i, 0)),   # x row tile
                pl.BlockSpec((tm, D), lambda i: (i, 0)),   # res row tile
                pl.BlockSpec((2, D), lambda i: (0, 0)),    # folded weights (grid-invariant)
            ],
            out_specs=pl.BlockSpec((tm, D), lambda i: (i, 0)),
        ),
        compiler_params=pltpu.CompilerParams(
            dimension_semantics=("parallel",),          # shards rows across v7x's 2 TCs
            vmem_limit_bytes=32 * 1024 * 1024,          # explicit budget (safe on v5e/v6e/v7x)
        ),
    )(x2, r2, wc)
    return out.reshape(B, S, D)


def gated_residual_ref(x, res, w):
    """Pure-JAX reference mirroring the PyTorch module exactly."""
    D = x.shape[-1]
    gate_input = jnp.concatenate([x, res, x - res], axis=-1)       # (..., 3D)
    logit = gate_input @ w.reshape(3 * D)                          # (...,)
    gate = jax.nn.sigmoid(logit)[..., None]
    return x * gate + res * (1.0 - gate)


if __name__ == "__main__":
    key = jax.random.PRNGKey(0)
    kx, kr, kw = jax.random.split(key, 3)

    # batch=2, seq=8, hidden dim=128 (lane-dense last dim)
    B, S, D = 2, 8, 128
    x = jax.random.normal(kx, (B, S, D), dtype=jnp.float32)
    res = jax.random.normal(kr, (B, S, D), dtype=jnp.float32)

    # Gate projection weight: torch nn.Linear(3*D, 1, bias=False).weight layout (1, 3*D)
    w = jax.random.normal(kw, (1, 3 * D), dtype=jnp.float32) / jnp.sqrt(3.0 * D)

    out = gated_residual(x, res, w)
    out = jax.block_until_ready(out)

    ref = gated_residual_ref(x, res, w)
    assert out.shape == (B, S, D)
    assert jnp.allclose(out, ref, atol=1e-4, rtol=1e-4), "mismatch vs reference"

    print("KERNEL_OK")
</pallas_src>

<mosaic_0001>
module attributes {stable_mosaic.version = 11 : i64} {
  func.func @_gated_residual_kernel(%arg0: i32, %arg1: memref<16x128xf32, #tpu.memory_space<vmem>>, %arg2: memref<16x128xf32, #tpu.memory_space<vmem>>, %arg3: memref<2x128xf32, #tpu.memory_space<vmem>>, %arg4: memref<16x128xf32, #tpu.memory_space<vmem>>) attributes {dimension_semantics = [#tpu.dimension_semantics<parallel>], iteration_bounds = array<i64: 1>, scalar_prefetch = 0 : i64, scratch_operands = 0 : i64, tpu.core_type = #tpu.core_type<tc>, window_params = [{transform_indices = @transform_0, window_bounds = array<i64: 16, 128>}, {transform_indices = @transform_1, window_bounds = array<i64: 16, 128>}, {pipeline_mode = #tpu.pipeline_mode<synchronous>, transform_indices = @transform_2, window_bounds = array<i64: 2, 128>}, {transform_indices = @transform_3, window_bounds = array<i64: 16, 128>}]} {
    %c0 = arith.constant 0 : index
    %c0_0 = arith.constant 0 : index
    %0 = vector.load %arg1[%c0, %c0_0] : memref<16x128xf32, #tpu.memory_space<vmem>>, vector<16x128xf32>
    %c0_1 = arith.constant 0 : index
    %c0_2 = arith.constant 0 : index
    %1 = vector.load %arg2[%c0_1, %c0_2] : memref<16x128xf32, #tpu.memory_space<vmem>>, vector<16x128xf32>
    %c0_3 = arith.constant 0 : index
    %c0_4 = arith.constant 0 : index
    %2 = vector.load %arg3[%c0_3, %c0_4] : memref<2x128xf32, #tpu.memory_space<vmem>>, vector<1x128xf32>
    %c1 = arith.constant 1 : index
    %c0_5 = arith.constant 0 : index
    %3 = vector.load %arg3[%c1, %c0_5] : memref<2x128xf32, #tpu.memory_space<vmem>>, vector<1x128xf32>
    %4 = vector.broadcast %2 : vector<1x128xf32> to vector<16x128xf32>
    %5 = arith.mulf %0, %4 : vector<16x128xf32>
    %6 = vector.broadcast %3 : vector<1x128xf32> to vector<16x128xf32>
    %7 = arith.mulf %1, %6 : vector<16x128xf32>
    %8 = arith.addf %5, %7 : vector<16x128xf32>
    %cst = arith.constant dense<0.000000e+00> : vector<16xf32>
    %9 = vector.multi_reduction <add>, %8, %cst [1] : vector<16x128xf32> to vector<16xf32>
    %10 = vector.shape_cast %9 : vector<16xf32> to vector<16x1xf32>
    %11 = arith.negf %10 : vector<16x1xf32>
    %12 = math.exp %11 : vector<16x1xf32>
    %cst_6 = arith.constant 1.000000e+00 : f32
    %13 = vector.broadcast %cst_6 : f32 to vector<16x1xf32>
    %14 = arith.addf %13, %12 : vector<16x1xf32>
    %15 = arith.divf %13, %14 : vector<16x1xf32>
    %16 = arith.subf %0, %1 : vector<16x128xf32>
    %17 = vector.broadcast %15 : vector<16x1xf32> to vector<16x128xf32>
    %18 = arith.mulf %16, %17 : vector<16x128xf32>
    %19 = arith.addf %1, %18 : vector<16x128xf32>
    %c0_7 = arith.constant 0 : index
    %c0_8 = arith.constant 0 : index
    %20 = vector.load %arg4[%c0_7, %c0_8] : memref<16x128xf32, #tpu.memory_space<vmem>>, vector<16x128xf32>
    tpu.vector_store %arg4[%c0_7, %c0_8], %19 {strides = array<i32>} : memref<16x128xf32, #tpu.memory_space<vmem>>, vector<16x128xf32>,
    return
  }
  func.func @transform_0(%arg0: i32) -> (i32, i32) {
    %c0_i32 = arith.constant 0 : i32
    %c0_i32_0 = arith.constant 0 : i32
    return %arg0, %c0_i32 : i32, i32
  }
  func.func @transform_1(%arg0: i32) -> (i32, i32) {
    %c0_i32 = arith.constant 0 : i32
    %c0_i32_0 = arith.constant 0 : i32
    return %arg0, %c0_i32 : i32, i32
  }
  func.func @transform_2(%arg0: i32) -> (i32, i32) {
    %c0_i32 = arith.constant 0 : i32
    %c0_i32_0 = arith.constant 0 : i32
    %c0_i32_1 = arith.constant 0 : i32
    return %c0_i32, %c0_i32_0 : i32, i32
  }
  func.func @transform_3(%arg0: i32) -> (i32, i32) {
    %c0_i32 = arith.constant 0 : i32
    %c0_i32_0 = arith.constant 0 : i32
    return %arg0, %c0_i32 : i32, i32
  }
}

</mosaic_0001>

<bundles_post_ra>
// kernel: tpu_custom_call.1
= control target key start
LH: loop header
LB: loop body
LE: loop exit
PB: predicated region body
PF: predicated region fallthrough
CT: control target
= control target key end

     0   :  { %8 = vsyncpa [#allocation3], 0  ;;  %s270_s0 = inlined_call_operand.hbm [shape: f32[16,128], index: 0, kind: input, shape index: {}]   ;;  %s271_s1 = inlined_call_operand.hbm [shape: f32[16,128], index: 1, kind: input, shape index: {}]   ;;  %s272_s2 = inlined_call_operand.vmem [shape: f32[2,128], index: 2, kind: input, shape index: {}]   ;;  %s273_s3 = inlined_call_operand.hbm [shape: f32[16,128], index: 3, kind: output, shape index: {}]  }
   0x1   :  { %9 = vsyncpa [#allocation6], 0 }
   0x2   :  { %10 = vsyncpa [#allocation4], 0  ;;  %s194_s12 = smov [#allocation2]   ;;  %s122_s16 = scalar_lea.hbm %s270_s0, 256 }
   0x3   :  { %s16_s13 = sshll.u32 %s194_s12, 4  ;;  %p123_p0 = scmp.ne.s32.totalorder %s270_s0, %s122_s16  ;;  %s17_s13 = int_to_ptr.vmem [resolvable:$true] %s16_s13 }
   0x4   :  { %p126_p1 = scmp.lt.u32.totalorder %s122_s16, %s270_s0 }
   0x6   :  { %p128_p2 = pnand %p126_p1, %p123_p0 }
   0x8   :  { %131 = shalt.err (!%p128_p2)
}
   0x9   :  { %s132_s21 = scalar_lea.vmem %s17_s13, 256  ;;  %p137_p4 = scmp.lt.s32.totalorder %s17_s13, %s17_s13 }
   0xa   :  { %p133_p3 = scmp.ne.s32.totalorder %s17_s13, %s132_s21  ;;  %p138_p5 = scmp.lt.s32.totalorder %s132_s21, %s132_s21 }
   0xc   :  { %p139_p6 = por %p138_p5, %p137_p4 }
   0xe   :  { %p140_p7 = pnand %p139_p6, %p133_p3 }
  0x10   :  { %143 = shalt.err (!%p140_p7)
}
  0x11   :  { %s195_s22 = smov 128   ;;  %s196_s23 = smov 8  }
  0x12   :  { %22 = dma.hbm_to_vmem [thread:$0]  %s270_s0, 256, %s17_s13, [#allocation3], %s195_s22, %s195_s22, %s196_s23  }
  0x13   :  { %s197_s26 = smov [#allocation5]   ;;  %s144_s30 = scalar_lea.hbm %s271_s1, 256 }
  0x14   :  { %s28_s27 = sshll.u32 %s197_s26, 4  ;;  %p145_p8 = scmp.ne.s32.totalorder %s271_s1, %s144_s30  ;;  %s29_s27 = int_to_ptr.vmem [resolvable:$true] %s28_s27 }
  0x15   :  { %p148_p9 = scmp.lt.u32.totalorder %s144_s30, %s271_s1 }
  0x17   :  { %p150_p10 = pnand %p148_p9, %p145_p8 }
  0x19   :  { %153 = shalt.err (!%p150_p10)
}
  0x1a   :  { %s154_s8 = scalar_lea.vmem %s29_s27, 256  ;;  %p159_p12 = scmp.lt.s32.totalorder %s29_s27, %s29_s27 }
  0x1b   :  { %p155_p11 = scmp.ne.s32.totalorder %s29_s27, %s154_s8  ;;  %p160_p13 = scmp.lt.s32.totalorder %s154_s8, %s154_s8 }
  0x1d   :  { %p161_p0 = por %p160_p13, %p159_p12 }
  0x1f   :  { %p162_p1 = pnand %p161_p0, %p155_p11 }
  0x21   :  { %165 = shalt.err (!%p162_p1)
}
  0x22   :  { %34 = dma.hbm_to_vmem [thread:$0]  %s271_s1, 256, %s29_s27, [#allocation6], %s195_s22, %s195_s22, %s196_s23  }
  0x23   :  { %188 = dma.done.wait [#allocation3], 256  }
  0x24   :  { %189 = vsyncadd [#allocation3], 4294967040 }
  0x25   :  { %190 = dma.done.wait [#allocation6], 256  }
  0x26   :  { %191 = vsyncadd [#allocation6], 4294967040  ;;  %v43_v0 = vld [vmem:[#allocation2] sm:$0xff]  ;;  %v45_v1 = vld [vmem:[#allocation5] sm:$0xff]  ;;  %s198_s1 = smov [#allocation7]  }
  0x27   :  { %v105_v2 = vld [vmem:[%s272_s2] ss:$0 sm:$0xff]  ;;  %v106_v3 = vld [vmem:[%s272_s2 + $0x1] ss:$0 sm:$0xff]  ;;  %v44_v5 = vld [vmem:[#allocation2 + $0x8] sm:$0xff]  ;;  %v79_v20 = vsub.f32 %v43_v0, %v45_v1  ;;  %s92_s2 = sshll.u32 %s198_s1, 4  ;;  %s93_s2 = int_to_ptr.vmem [resolvable:$true] %s92_s2 }
  0x28   :  { %v53_v4 = vmul.f32 %v105_v2, %v43_v0  ;;  %v46_v6 = vld [vmem:[#allocation5 + $0x8] sm:$0xff]  ;;  %v59_v7 = vmul.f32 %v106_v3, %v45_v1  ;;  %v54_v8 = vmul.f32 %v105_v2, %v44_v5  ;;  %s166_s14 = scalar_lea.vmem %s93_s2, 256  ;;  %p171_p3 = scmp.lt.s32.totalorder %s93_s2, %s93_s2 }
  0x29   :  { %v60_v9 = vmul.f32 %v106_v3, %v46_v6  ;;  %v80_v22 = vsub.f32 %v44_v5, %v46_v6  ;;  %p167_p2 = scmp.ne.s32.totalorder %s93_s2, %s166_s14  ;;  %p172_p4 = scmp.lt.s32.totalorder %s166_s14, %s166_s14 }
  0x2a   :  { %v61_v10 = vadd.f32 %v59_v7, %v53_v4 }
  0x2b   :  { %v62_v11 = vadd.f32 %v60_v9, %v54_v8  ;;  %p173_p5 = por %p172_p4, %p171_p3 }
  0x2c   :  { %63 = vadd.xlane.f32.xlu0 %v61_v10 }
  0x2d   :  { %p174_p6 = pnand %p173_p5, %p167_p2 }
  0x30   :  { %65 = vadd.xlane.f32.xlu0 %v62_v11 }
  0xb9   :  { %v64_v12 = vpop.xlane.xlu0 %63 }
  0xba   :  { %v107_v13 = vmul.f32 -1.442695, %v64_v12 }
  0xbc   :  { %114 = vpow2.f32 %v107_v13 }
  0xbd   :  { %v66_v14 = vpop.xlane.xlu0 %65 }
  0xbe   :  { %v108_v15 = vmul.f32 -1.442695, %v66_v14 }
  0xc0   :  { %116 = vpow2.f32 %v108_v15 }
  0xc6   :  { %v115_v16 = vpop.eup %114 }
  0xc7   :  { %v73_v17 = vadd.f32 1.0, %v115_v16 }
  0xc9   :  { %118 = vrcp.f32 %v73_v17 }
  0xca   :  { %v117_v18 = vpop.eup %116 }
  0xcb   :  { %v74_v19 = vadd.f32 1.0, %v117_v18 }
  0xcd   :  { %120 = vrcp.f32 %v74_v19 }
  0xd3   :  { %v119_v21 = vpop.eup %118 }
  0xd4   :  { %v81_v23 = vmul.f32 %v119_v21, %v79_v20 }
  0xd6   :  { %v83_v24 = vadd.f32 %v81_v23, %v45_v1 }
  0xd7   :  { %v121_v25 = vpop.eup %120 }
  0xd8   :  { %v82_v26 = vmul.f32 %v121_v25, %v80_v22  ;;  %85 = vst [vmem:[#allocation7] sm:$0xff] %v83_v24 }
  0xda   :  { %v84_v27 = vadd.f32 %v82_v26, %v46_v6 }
  0xdc   :  { %86 = vst [vmem:[#allocation7 + $0x8] sm:$0xff] %v84_v27 }
  0xdd   :  { %177 = shalt.err (!%p174_p6)
}
  0xde   :  { %s178_s17 = scalar_lea.hbm %s273_s3, 256 }
  0xdf   :  { %p179_p7 = scmp.ne.s32.totalorder %s273_s3, %s178_s17  ;;  %p182_p8 = scmp.lt.u32.totalorder %s178_s17, %s273_s3 }
  0xe1   :  { %p184_p9 = pnand %p182_p8, %p179_p7 }
  0xe3   :  { %187 = shalt.err (!%p184_p9)
}
  0xe4   :  { %98 = dma.vmem_to_hbm [thread:$0]  %s93_s2, 256, %s273_s3, [#allocation4], %s195_s22, %s195_s22, %s196_s23  }
  0xe5   :  { %192 = dma.done.wait [#allocation4], 256  }
  0xe6   :  { %193 = vsyncadd [#allocation4], 4294967040 }
  0xe7   :  { %102 = vsyncpa [#allocation3], 1 }
  0xe8   :  { %103 = vsyncpa [#allocation6], 1 }
  0xe9   :  { %104 = vsyncpa [#allocation4], 1 }

</bundles_post_ra>
